<compile_context>
chip_gen: v6e
topology: v6e:2x2x1
jax: 0.10.0
libtpu: 0.0.40
codegen_flags: <defaults>
</compile_context>

<pallas_src>
import functools

import jax
import jax.numpy as jnp
from jax import lax
from jax.experimental import pallas as pl
from jax.experimental.pallas import tpu as pltpu


def _round_up(n: int, m: int) -> int:
    return ((n + m - 1) // m) * m


def _pick_tile(dim: int, cap: int, *, min_tiles: int = 1, unit: int = 128) -> int:
    """Largest multiple-of-`unit` tile <= cap that minimizes zero padding.

    If `min_tiles` > 1 and the (unit-padded) dim supports it, only tiles that
    yield at least `min_tiles` blocks are considered (so e.g. both v7x
    TensorCores get output tiles).
    """
    dim_u = _round_up(dim, unit)
    cap = max(unit, min((cap // unit) * unit, dim_u))
    need_multi = (dim_u // unit) >= min_tiles
    best_t, best_pad = None, None
    for t in range(unit, cap + 1, unit):
        padded = _round_up(dim, t)
        if need_multi and padded // t < min_tiles:
            continue
        pad = padded - dim
        if best_pad is None or pad < best_pad or (pad == best_pad and t > best_t):
            best_t, best_pad = t, pad
    return best_t if best_t is not None else unit


# ---------------------------------------------------------------------------
# Kernel
# ---------------------------------------------------------------------------
def _bbb_linear_kernel(x_ref, wmu_ref, wlv_ref, epsw_ref,
                       bmu_ref, blv_ref, epsb_ref,
                       o_ref, acc_ref, *, matmul_dtype):
    k = pl.program_id(2)

    @pl.when(k == 0)
    def _init():
        acc_ref[...] = jnp.zeros_like(acc_ref)

    # Reparameterized weight tile, sampled in the stream dtype.  exp() runs on
    # the EUP (idle slot in this DMA-bound kernel) and the mul+add on the VPU;
    # no weight-sized wrapper-side pass and no f32-upcast temporary.
    w = wmu_ref[...] + jnp.exp(wlv_ref[...]) * epsw_ref[...]

    # Contract x (TB, TK) with w (TN, TK) on their last (lane) dims -> (TB, TN);
    # no in-kernel transpose of the freshly sampled weight tile.
    acc_ref[...] += lax.dot_general(
        x_ref[...].astype(matmul_dtype), w.astype(matmul_dtype),
        dimension_numbers=(((1,), (1,)), ((), ())),
        preferred_element_type=jnp.float32)

    @pl.when(k == pl.num_programs(2) - 1)
    def _finalize():
        b = (bmu_ref[...].astype(jnp.float32)
             + jnp.exp(blv_ref[...].astype(jnp.float32))
             * epsb_ref[...].astype(jnp.float32))
        o_ref[...] = (acc_ref[...] + b).astype(o_ref.dtype)


# ---------------------------------------------------------------------------
# Wrapper
# ---------------------------------------------------------------------------
def bbb_linear(x, W_mu, W_log_var, b_mu, b_log_var,
               *, eps_W=None, eps_b=None, key=None,
               tn_max=512, tk_max=2048, tb_max=512,
               matmul_dtype=jnp.bfloat16):
    """BBBLinear forward:

        y = x @ (W_mu + exp(W_log_var) * eps_W).T + (b_mu + exp(b_log_var) * eps_b)

    Pass (eps_W, eps_b) explicitly for a deterministic forward (exact-check
    mode), or pass a jax.random `key` and fresh N(0,1) noise is drawn per call
    (same semantics as the PyTorch module's torch.randn per forward).
    """
    assert (eps_W is None) == (eps_b is None)
    B, In = x.shape
    Out, In2 = W_mu.shape
    assert In == In2

    if eps_W is None:
        if key is None:
            raise ValueError("pass either (eps_W, eps_b) or a jax.random key")
        kw, kb = jax.random.split(key)
        eps_W = jax.random.normal(kw, (Out, In), jnp.float32)
        eps_b = jax.random.normal(kb, (Out,), jnp.float32)

    # Weight-sized streams are stored/streamed in the matmul dtype (bf16 halves
    # HBM bytes on v6e/v7x); x and the tiny bias vectors stay f32.
    stream_dtype = (jnp.bfloat16
                    if jnp.dtype(matmul_dtype) == jnp.dtype(jnp.bfloat16)
                    else jnp.float32)

    # --- tile selection: minimize padding bytes, keep >=2 Out tiles ---------
    tk = _pick_tile(In, tk_max, min_tiles=1)
    tn = _pick_tile(Out, tn_max, min_tiles=2)
    tb = min(_round_up(max(B, 8), 8), tb_max)

    Inp = _round_up(In, tk)
    Outp = _round_up(Out, tn)
    Bp = _round_up(max(B, tb), tb)

    def pad2(a, rows, cols, dtype):
        a = a.astype(dtype)
        if a.shape == (rows, cols):
            return a
        return jnp.pad(a, ((0, rows - a.shape[0]), (0, cols - a.shape[1])))

    def padv(v):
        v = v.astype(jnp.float32)
        if v.shape[0] != Outp:
            v = jnp.pad(v, ((0, Outp - v.shape[0]),))
        return v.reshape(1, Outp)

    # Padding is zero everywhere: exp(0)*0 noise in padded regions multiplies
    # zero-padded x columns, so padded regions contribute nothing; padded
    # output rows/cols are sliced off at the end.
    xp = pad2(x, Bp, Inp, jnp.float32)
    wmu_p = pad2(W_mu, Outp, Inp, stream_dtype)
    wlv_p = pad2(W_log_var, Outp, Inp, stream_dtype)
    epsw_p = pad2(eps_W, Outp, Inp, stream_dtype)
    bmu_p, blv_p, epsb_p = padv(b_mu), padv(b_log_var), padv(eps_b)

    grid = (Bp // tb, Outp // tn, Inp // tk)

    x_spec = pl.BlockSpec((tb, tk), lambda b, i, k: (b, k))
    w_spec = pl.BlockSpec((tn, tk), lambda b, i, k: (i, k))
    v_spec = pl.BlockSpec((1, tn), lambda b, i, k: (0, i))
    out_spec = pl.BlockSpec((tb, tn), lambda b, i, k: (b, i))

    # VMEM at defaults (bf16, tn=512, tk=2048, tb<=512): 3 weight streams x 2
    # buffers ~12 MiB + x/out/acc/sampled-w temporaries — comfortably under the
    # 48 MiB limit (itself under v7x's 64 MiB physical).
    compiler_params = pltpu.CompilerParams(
        dimension_semantics=("parallel", "parallel", "arbitrary"),
        vmem_limit_bytes=48 * 1024 * 1024)

    yp = pl.pallas_call(
        functools.partial(_bbb_linear_kernel, matmul_dtype=matmul_dtype),
        out_shape=jax.ShapeDtypeStruct((Bp, Outp), x.dtype),
        grid_spec=pltpu.PrefetchScalarGridSpec(
            num_scalar_prefetch=0,
            grid=grid,
            in_specs=[x_spec, w_spec, w_spec, w_spec, v_spec, v_spec, v_spec],
            out_specs=out_spec,
            scratch_shapes=[pltpu.VMEM((tb, tn), jnp.float32)]),
        compiler_params=compiler_params,
    )(xp, wmu_p, wlv_p, epsw_p, bmu_p, blv_p, epsb_p)

    return yp[:B, :Out]


# ---------------------------------------------------------------------------
# Demo / self-check
# ---------------------------------------------------------------------------
if __name__ == "__main__":
    # Small but tiling-exercising shapes: batch=6, in=200, out=300 pads to
    # (8, 256) x (384, 256) with a (1, 3, 1) grid (tn=128, tk=256).
    batch, in_features, out_features = 6, 200, 300

    key = jax.random.PRNGKey(0)
    k_x, k_wmu, k_epsw, k_epsb, k_fwd, k_fwd2 = jax.random.split(key, 6)

    # Deterministic parameter init mirroring reset_parameters():
    #   W_mu ~ kaiming_normal_ (std = sqrt(2 / fan_in)), W_log_var = -3,
    #   b_mu = 0, b_log_var = -3.
    W_mu = jax.random.normal(k_wmu, (out_features, in_features), jnp.float32) \
        * jnp.sqrt(2.0 / in_features)
    W_log_var = jnp.full((out_features, in_features), -3.0, jnp.float32)
    b_mu = jnp.zeros((out_features,), jnp.float32)
    b_log_var = jnp.full((out_features,), -3.0, jnp.float32)

    x = jax.random.normal(k_x, (batch, in_features), jnp.float32)
    eps_W = jax.random.normal(k_epsw, (out_features, in_features), jnp.float32)
    eps_b = jax.random.normal(k_epsb, (out_features,), jnp.float32)

    # Pure-JAX reference of the module's forward math (deterministic noise).
    W_ref = W_mu + jnp.exp(W_log_var) * eps_W
    b_ref = b_mu + jnp.exp(b_log_var) * eps_b
    y_ref = x @ W_ref.T + b_ref

    # 1) Explicit-eps mode, f32 matmul -> tight check of the full math.
    y_f32 = jax.block_until_ready(
        bbb_linear(x, W_mu, W_log_var, b_mu, b_log_var,
                   eps_W=eps_W, eps_b=eps_b, matmul_dtype=jnp.float32))
    assert y_f32.shape == (batch, out_features)
    assert jnp.allclose(y_f32, y_ref, atol=1e-4, rtol=1e-4)

    # 2) Explicit-eps mode, bf16 fast path (production dtype on v6e/v7x).
    y_bf16 = jax.block_until_ready(
        bbb_linear(x, W_mu, W_log_var, b_mu, b_log_var,
                   eps_W=eps_W, eps_b=eps_b, matmul_dtype=jnp.bfloat16))
    assert jnp.allclose(y_bf16, y_ref, atol=5e-2, rtol=5e-2)

    # 3) Fresh-noise mode (eps drawn per call from a key, like torch.randn):
    #    reproducible per key, different across keys.
    y_a = jax.block_until_ready(bbb_linear(x, W_mu, W_log_var, b_mu, b_log_var, key=k_fwd))
    y_b = jax.block_until_ready(bbb_linear(x, W_mu, W_log_var, b_mu, b_log_var, key=k_fwd))
    y_c = jax.block_until_ready(bbb_linear(x, W_mu, W_log_var, b_mu, b_log_var, key=k_fwd2))
    assert y_a.shape == (batch, out_features)
    assert bool(jnp.all(jnp.isfinite(y_a)))
    assert jnp.array_equal(y_a, y_b)                  # same key -> identical
    assert not jnp.allclose(y_a, y_c, atol=1e-6)      # different key -> different

    # 4) sigma -> ~0 collapses to the deterministic linear map.
    tiny_wlv = jnp.full_like(W_log_var, -30.0)        # sigma ~ 1e-13
    tiny_blv = jnp.full_like(b_log_var, -30.0)
    y_mean = jax.block_until_ready(
        bbb_linear(x, W_mu, tiny_wlv, b_mu, tiny_blv,
                   key=k_fwd, matmul_dtype=jnp.float32))
    assert jnp.allclose(y_mean, x @ W_mu.T + b_mu, atol=1e-4, rtol=1e-4)

    print("KERNEL_OK")
</pallas_src>

<mosaic_0001>
module attributes {stable_mosaic.version = 11 : i64} {
  func.func @_bbb_linear_kernel(%arg0: i32, %arg1: i32, %arg2: i32, %arg3: memref<8x256xf32, #tpu.memory_space<vmem>>, %arg4: memref<128x256xf32, #tpu.memory_space<vmem>>, %arg5: memref<128x256xf32, #tpu.memory_space<vmem>>, %arg6: memref<128x256xf32, #tpu.memory_space<vmem>>, %arg7: memref<1x128xf32, #tpu.memory_space<vmem>>, %arg8: memref<1x128xf32, #tpu.memory_space<vmem>>, %arg9: memref<1x128xf32, #tpu.memory_space<vmem>>, %arg10: memref<8x128xf32, #tpu.memory_space<vmem>>, %arg11: memref<8x128xf32, #tpu.memory_space<vmem>>) attributes {dimension_semantics = [#tpu.dimension_semantics<parallel>, #tpu.dimension_semantics<parallel>, #tpu.dimension_semantics<arbitrary>], iteration_bounds = array<i64: 1, 3, 1>, scalar_prefetch = 0 : i64, scratch_operands = 1 : i64, tpu.core_type = #tpu.core_type<tc>, window_params = [{transform_indices = @transform_0, window_bounds = array<i64: 8, 256>}, {transform_indices = @transform_1, window_bounds = array<i64: 128, 256>}, {transform_indices = @transform_2, window_bounds = array<i64: 128, 256>}, {transform_indices = @transform_3, window_bounds = array<i64: 128, 256>}, {transform_indices = @transform_4, window_bounds = array<i64: 1, 128>}, {transform_indices = @transform_5, window_bounds = array<i64: 1, 128>}, {transform_indices = @transform_6, window_bounds = array<i64: 1, 128>}, {transform_indices = @transform_7, window_bounds = array<i64: 8, 128>}]} {
    %c0_i32 = arith.constant 0 : i32
    %0 = arith.cmpi eq, %arg2, %c0_i32 : i32
    %1 = arith.extui %0 : i1 to i32
    %c0_i32_0 = arith.constant 0 : i32
    %2 = arith.cmpi ne, %1, %c0_i32_0 : i32
    scf.if %2 {
      %cst_14 = arith.constant 0.000000e+00 : f32
      %17 = vector.broadcast %cst_14 : f32 to vector<8x128xf32>
      %c0_15 = arith.constant 0 : index
      %c0_16 = arith.constant 0 : index
      %18 = vector.load %arg11[%c0_15, %c0_16] : memref<8x128xf32, #tpu.memory_space<vmem>>, vector<8x128xf32>
      tpu.vector_store %arg11[%c0_15, %c0_16], %17 {strides = array<i32>} : memref<8x128xf32, #tpu.memory_space<vmem>>, vector<8x128xf32>,
    } else {
    }
    %c0 = arith.constant 0 : index
    %c0_1 = arith.constant 0 : index
    %3 = vector.load %arg4[%c0, %c0_1] : memref<128x256xf32, #tpu.memory_space<vmem>>, vector<128x256xf32>
    %c0_2 = arith.constant 0 : index
    %c0_3 = arith.constant 0 : index
    %4 = vector.load %arg5[%c0_2, %c0_3] : memref<128x256xf32, #tpu.memory_space<vmem>>, vector<128x256xf32>
    %5 = math.exp %4 : vector<128x256xf32>
    %c0_4 = arith.constant 0 : index
    %c0_5 = arith.constant 0 : index
    %6 = vector.load %arg6[%c0_4, %c0_5] : memref<128x256xf32, #tpu.memory_space<vmem>>, vector<128x256xf32>
    %7 = arith.mulf %5, %6 : vector<128x256xf32>
    %8 = arith.addf %3, %7 : vector<128x256xf32>
    %c0_6 = arith.constant 0 : index
    %c0_7 = arith.constant 0 : index
    %9 = vector.load %arg11[%c0_6, %c0_7] : memref<8x128xf32, #tpu.memory_space<vmem>>, vector<8x128xf32>
    %c0_8 = arith.constant 0 : index
    %c0_9 = arith.constant 0 : index
    %10 = vector.load %arg3[%c0_8, %c0_9] : memref<8x256xf32, #tpu.memory_space<vmem>>, vector<8x256xf32>
    %cst = arith.constant dense<0.000000e+00> : vector<8x128xf32>
    %11 = tpu.matmul %10, %8, %cst {dimension_numbers = #tpu.dot_dimension_numbers<[1], [1], [0], [0], [0, 0, 1, 0], [], []>} : vector<8x256xf32>, vector<128x256xf32>, vector<8x128xf32> -> vector<8x128xf32>
    %12 = arith.addf %9, %11 : vector<8x128xf32>
    %c0_10 = arith.constant 0 : index
    %c0_11 = arith.constant 0 : index
    %13 = vector.load %arg11[%c0_10, %c0_11] : memref<8x128xf32, #tpu.memory_space<vmem>>, vector<8x128xf32>
    tpu.vector_store %arg11[%c0_10, %c0_11], %12 {strides = array<i32>} : memref<8x128xf32, #tpu.memory_space<vmem>>, vector<8x128xf32>,
    %c0_i32_12 = arith.constant 0 : i32
    %14 = arith.cmpi eq, %arg2, %c0_i32_12 : i32
    %15 = arith.extui %14 : i1 to i32
    %c0_i32_13 = arith.constant 0 : i32
    %16 = arith.cmpi ne, %15, %c0_i32_13 : i32
    scf.if %16 {
      %c0_14 = arith.constant 0 : index
      %c0_15 = arith.constant 0 : index
      %17 = vector.load %arg7[%c0_14, %c0_15] : memref<1x128xf32, #tpu.memory_space<vmem>>, vector<1x128xf32>
      %c0_16 = arith.constant 0 : index
      %c0_17 = arith.constant 0 : index
      %18 = vector.load %arg8[%c0_16, %c0_17] : memref<1x128xf32, #tpu.memory_space<vmem>>, vector<1x128xf32>
      %19 = math.exp %18 : vector<1x128xf32>
      %c0_18 = arith.constant 0 : index
      %c0_19 = arith.constant 0 : index
      %20 = vector.load %arg9[%c0_18, %c0_19] : memref<1x128xf32, #tpu.memory_space<vmem>>, vector<1x128xf32>
      %21 = arith.mulf %19, %20 : vector<1x128xf32>
      %22 = arith.addf %17, %21 : vector<1x128xf32>
      %c0_20 = arith.constant 0 : index
      %c0_21 = arith.constant 0 : index
      %23 = vector.load %arg11[%c0_20, %c0_21] : memref<8x128xf32, #tpu.memory_space<vmem>>, vector<8x128xf32>
      %24 = vector.broadcast %22 : vector<1x128xf32> to vector<8x128xf32>
      %25 = arith.addf %23, %24 : vector<8x128xf32>
      %c0_22 = arith.constant 0 : index
      %c0_23 = arith.constant 0 : index
      %26 = vector.load %arg10[%c0_22, %c0_23] : memref<8x128xf32, #tpu.memory_space<vmem>>, vector<8x128xf32>
      tpu.vector_store %arg10[%c0_22, %c0_23], %25 {strides = array<i32>} : memref<8x128xf32, #tpu.memory_space<vmem>>, vector<8x128xf32>,
    } else {
    }
    return
  }
  func.func @transform_0(%arg0: i32, %arg1: i32, %arg2: i32) -> (i32, i32) {
    %c0_i32 = arith.constant 0 : i32
    return %arg0, %arg2 : i32, i32
  }
  func.func @transform_1(%arg0: i32, %arg1: i32, %arg2: i32) -> (i32, i32) {
    %c0_i32 = arith.constant 0 : i32
    return %arg1, %arg2 : i32, i32
  }
  func.func @transform_2(%arg0: i32, %arg1: i32, %arg2: i32) -> (i32, i32) {
    %c0_i32 = arith.constant 0 : i32
    return %arg1, %arg2 : i32, i32
  }
  func.func @transform_3(%arg0: i32, %arg1: i32, %arg2: i32) -> (i32, i32) {
    %c0_i32 = arith.constant 0 : i32
    return %arg1, %arg2 : i32, i32
  }
  func.func @transform_4(%arg0: i32, %arg1: i32, %arg2: i32) -> (i32, i32) {
    %c0_i32 = arith.constant 0 : i32
    %c0_i32_0 = arith.constant 0 : i32
    return %c0_i32, %arg1 : i32, i32
  }
  func.func @transform_5(%arg0: i32, %arg1: i32, %arg2: i32) -> (i32, i32) {
    %c0_i32 = arith.constant 0 : i32
    %c0_i32_0 = arith.constant 0 : i32
    return %c0_i32, %arg1 : i32, i32
  }
  func.func @transform_6(%arg0: i32, %arg1: i32, %arg2: i32) -> (i32, i32) {
    %c0_i32 = arith.constant 0 : i32
    %c0_i32_0 = arith.constant 0 : i32
    return %c0_i32, %arg1 : i32, i32
  }
  func.func @transform_7(%arg0: i32, %arg1: i32, %arg2: i32) -> (i32, i32) {
    %c0_i32 = arith.constant 0 : i32
    return %arg0, %arg1 : i32, i32
  }
}

</mosaic_0001>

<bundles_post_ra>
// kernel: tpu_custom_call.1
= control target key start
LH: loop header
LB: loop body
LE: loop exit
PB: predicated region body
PF: predicated region fallthrough
CT: control target
= control target key end

     0   :  { %s1771_s0 = inlined_call_operand.hbm [shape: f32[8,256], index: 0, kind: input, shape index: {}]   ;;  %s1772_s1 = inlined_call_operand.hbm [shape: f32[384,256], index: 1, kind: input, shape index: {}]   ;;  %s1773_s2 = inlined_call_operand.hbm [shape: f32[384,256], index: 2, kind: input, shape index: {}]   ;;  %s1774_s3 = inlined_call_operand.hbm [shape: f32[384,256], index: 3, kind: input, shape index: {}]   ;;  %s1775_s4 = inlined_call_operand.vmem [shape: f32[1,384], index: 4, kind: input, shape index: {}]   ;;  %s1776_s5 = inlined_call_operand.vmem [shape: f32[1,384], index: 5, kind: input, shape index: {}]   ;;  %s1777_s6 = inlined_call_operand.vmem [shape: f32[1,384], index: 6, kind: input, shape index: {}]   ;;  %s1778_s7 = inlined_call_operand.hbm [shape: f32[8,384], index: 7, kind: output, shape index: {}]  }
   0x1   :  { %1790 = sst [smem:[#allocation21_spill]] %s1772_s1 }
   0x2   :  { %1791 = sst [smem:[#allocation22_spill]] %s1773_s2 }
   0x3   :  { %12 = vsyncpa [#allocation4], 0 }
   0x4   :  { %13 = vsyncpa [#allocation7], 0 }
   0x5   :  { %15 = vsyncpa [#allocation7 + $0x1], 0 }
   0x6   :  { %16 = vsyncpa [#allocation10], 0 }
   0x7   :  { %18 = vsyncpa [#allocation10 + $0x1], 0 }
   0x8   :  { %19 = vsyncpa [#allocation5], 0 }
   0x9   :  { %21 = vsyncpa [#allocation5 + $0x1], 0  ;;  %s1433_s24 = smov 0   ;;  %s1435_s25 = smov 0  }
   0xa   :  { %s1437_s26 = smov 0   ;;  %s1439_s27 = smov 0  }
   0xb   :  { %s1441_s28 = smov 0   ;;  %s1443_s29 = smov 0  }
   0xc LB: > { %1792 = sst [smem:[#allocation16_spill]] %s1364_s24  ;;  %s42_s30 = sadd.s32 1, %s1380_s28  ;;  %s1384_s29 = sphi %s1443_s29, %s27_s29   ;;  %s1380_s28 = sphi %s1441_s28, %s1816_s28   ;;  %s1376_s27 = sphi %s1439_s27, %s1815_s27   ;;  %s1372_s26 = sphi %s1437_s26, %s1819_s26   ;;  %s1368_s25 = sphi %s1435_s25, %s1818_s25   ;;  %s1364_s24 = sphi %s1433_s24, %s1817_s24  }
   0xd   : > { %1793 = sst [smem:[#allocation17_spill]] %s1380_s28  ;;  %s83_s8 = sadd.s32 1, %s1372_s26 }
   0xe   : > { %p44_p0 = scmp.ge.s32.totalorder %s42_s30, 3  ;;  %p90_p1 = scmp.ne.s32.totalorder %s1372_s26, %s1368_s25 }
   0xf   : > { %p91_p2 = scmp.eq.s32.totalorder %s1384_s29, 0  ;;  %p1066_p4 = scmp.lt.s32.totalorder %s1384_s29, 3 }
  0x10   : > { %s1821_s30 = smov (%p44_p0, %s42_s30), 0  ;;  %s298_s10 = sand.u32 1, %s1384_s29  }
  0x11   : > { %1794 = sst [smem:[#allocation18_spill]] %s1821_s30  ;;  %p92_p3 = por %p91_p2, %p90_p1 }
  0x12   : > { %s78_s9 = ssub.s32 %s1380_s28, %s1821_s30  ;;  %s1779_s11 = sand.u32 1, %s1372_s26  }
  0x13   : > { %p81_p5 = scmp.eq.s32.totalorder %s78_s9, 0  ;;  %s1479_s12 = sshll.u32 %s1380_s28, 12 }
  0x14   : > { %s1486_s14 = sshll.u32 %s1779_s11, 8  ;;  %s1796_s1 = sld [smem:[#allocation21_spill]] }
  0x15   : > { %s1482_s13 = scalar_select %p81_p5, %s1372_s26, %s83_s8  }
  0x16   : > { %p1492_p6 = pnand %p1066_p4, %p92_p3  ;;  %s302_s19 = scalar_lea.vmem [#allocation6], %s1486_s14 }
  0x17   : > { %1795 = sst [smem:[#allocation19_spill]] %s1482_s13  ;;  %s312_s20 = sshll.u32 %s302_s19, 4  ;;  %s313_s20 = int_to_ptr.vmem [resolvable:$true] %s312_s20 }
  0x18   : > { %s1497_s21 = scalar_lea.sflag [#allocation7], %s298_s10  ;;  %p1188_p7 = pneg %p1492_p6 }
  0x19   : > { %s1199_s22 = scalar_lea.vmem %s313_s20, 4096  ;;  %s1386_s23 = smov [#allocation6]  }
  0x1a   : > { %s311_s17 = scalar_lea.hbm %s1796_s1, %s1479_s12  ;;  %p1200_p8 = scmp.ne.s32.totalorder %s313_s20, %s1199_s22 }
  0x1b   : > { %s1204_s8 = sshll.u32 %s1386_s23, 4  ;;  %s1205_s8 = int_to_ptr.vmem [resolvable:$false] %s1204_s8 }
  0x1c   : > { %p1202_p9 = pnand %p1200_p8, %p1188_p7  ;;  %s1206_s9 = scalar_lea.vmem %s1205_s8, 8192 }
  0x1d   : > { %p1207_p11 = scmp.lt.s32.totalorder %s313_s20, %s1205_s8  ;;  %p1208_p12 = scmp.lt.s32.totalorder %s1206_s9, %s1199_s22 }
  0x1e   : > { %p1203_p10 = pneg %p1202_p9 }
  0x1f   : > { %p1209_p13 = por %p1208_p12, %p1207_p11 }
  0x21   : > { %p1210_p0 = pnand %p1209_p13, %p1203_p10 }
  0x23   : > { %1213 = shalt.err (!%p1210_p0)
}
  0x24   : > { %s1780_s15 = smov 256   ;;  %s1782_s10 = smov 16  }
  0x25   : > { %1054 = dma.hbm_to_vmem [thread:$0]  (!%p1492_p6), %s311_s17, 4096, %s313_s20, %s1497_s21, %s1780_s15, %s1780_s15, %s1782_s10  }
  0x26   : > { %s1511_s16 = sadd.s32 4294967295, %s1384_s29   ;;  %s1003_s19 = sadd.s32 4294967294, %s1384_s29  }
  0x27   : > { %p96_p2 = scmp.ne.s32.totalorder %s1368_s25, %s1364_s24  ;;  %p1788_p3 = scmp.eq.s32.totalorder %s1511_s16, 0 }
  0x28   : > { %p256_p4 = scmp.eq.s32.totalorder %s1511_s16, 2  ;;  %p262_p5 = scmp.eq.s32.totalorder %s1003_s19, 2 }
  0x29   : > { %p1004_p8 = scmp.ge.s32.totalorder %s1384_s29, 1  ;;  %p1521_p9 = por %p1788_p3, %p96_p2 }
  0x2a   : > { %p1528_p10 = por %p256_p4, %p90_p1  ;;  %p1532_p11 = por %p262_p5, %p96_p2 }
  0x2b   : > { %p269_p12 = scmp.lt.s32.totalorder %s1384_s29, 4  ;;  %s1389_s8 = smov [#allocation3]  }
  0x2c   : > { %s1799_s17 = scalar_select %p1528_p10, 1, 0 }
  0x2d   : > { %s1800_s20 = scalar_select %p1532_p11, 1, 0 }
  0x2e   : > { %p1537_p13 = pnand %p1004_p8, %p269_p12  ;;  %s287_s9 = sshll.u32 %s1389_s8, 4  ;;  %s1541_s9 = int_to_ptr.vmem [resolvable:$true] %s287_s9 }
  0x2f   : > { %1801 = sst [smem:[#allocation20_spill]] %s1800_s20  ;;  %s326_s10 = scalar_lea.vmem [#allocation8], %s1486_s14 }
  0x30   : > { %p1047_p0 = pneg %p1537_p13  ;;  %s1803_s2 = sld [smem:[#allocation22_spill]] }
  0x31   : > { %s336_s1 = sshll.u32 %s326_s10, 4  ;;  %s1390_s8 = smov [#allocation8]   ;;  %s337_s1 = int_to_ptr.vmem [resolvable:$true] %s336_s1 }
  0x32   : > { %p1552_p1 = pnand %p1047_p0, %p1788_p3  ;;  %s1227_s28 = scalar_lea.vmem %s337_s1, 4096 }
  0x33   : > { %p1228_p2 = scmp.ne.s32.totalorder %s337_s1, %s1227_s28  ;;  %s1232_s13 = sshll.u32 %s1390_s8, 4  ;;  %s1233_s13 = int_to_ptr.vmem [resolvable:$false] %s1232_s13 }
  0x34   : > { %s1234_s20 = scalar_lea.vmem %s1233_s13, 8192  ;;  %p1235_p8 = scmp.lt.s32.totalorder %s337_s1, %s1233_s13 }
  0x35   : > { %p1230_p4 = pnand %p1228_p2, %p1188_p7  ;;  %p1236_p12 = scmp.lt.s32.totalorder %s1234_s20, %s1227_s28 }
  0x36   : > { %s335_s15 = scalar_lea.hbm %s1803_s2, %s1479_s12 }
  0x37   : > { %p1231_p5 = pneg %p1230_p4  ;;  %p1237_p11 = por %p1236_p12, %p1235_p8 }
  0x39   : > { %p1238_p10 = pnand %p1237_p11, %p1231_p5 }
  0x3b   : > { %1241 = shalt.err (!%p1238_p10)
}
  0x3c   : > { %s1805_s11 = smov 16   ;;  %s1806_s10 = smov 256  }
  0x3d   : > { %1057 = dma.hbm_to_vmem [thread:$0]  (!%p1492_p6), %s335_s15, 4096, %s337_s1, %s1497_s21, %s1806_s10, %s1806_s10, %s1805_s11  }
  0x3e   : > { %p1244_p0 = pneg %p1552_p1  ;;  %s1253_s19 = scalar_lea.vmem %s1541_s9, 256 }
  0x3f   : > { %p1254_p2 = scmp.ne.s32.totalorder %s1541_s9, %s1253_s19  ;;  %p1261_p11 = scmp.lt.s32.totalorder %s1541_s9, %s1541_s9 }
  0x40   : > { %p1262_p10 = scmp.lt.s32.totalorder %s1253_s19, %s1253_s19 }
  0x41   : > { %p1256_p4 = pnand %p1254_p2, %p1244_p0 }
  0x42   : > { %p1263_p5 = por %p1262_p10, %p1261_p11 }
  0x43   : > { %p1257_p3 = pneg %p1256_p4 }
  0x45   : > { %p1264_p8 = pnand %p1263_p5, %p1257_p3 }
  0x47   : > { %1267 = shalt.err (!%p1264_p8)
}
  0x48   : > { %1050 = dma.hbm_to_vmem [thread:$0]  (!%p1552_p1), %s1771_s0, 256, %s1541_s9, [#allocation4]  }
  0x49   : > { %s359_s15 = scalar_lea.hbm %s1774_s3, %s1479_s12  ;;  %s350_s20 = scalar_lea.vmem [#allocation9], %s1486_s14 }
  0x4a   : > { %s360_s8 = sshll.u32 %s350_s20, 4  ;;  %s1807_s19 = sand.u32 1, %s1372_s26   ;;  %s361_s8 = int_to_ptr.vmem [resolvable:$true] %s360_s8 }
  0x4b   : > { %s347_s2 = scalar_lea.sflag [#allocation10], %s1807_s19  ;;  %s1281_s24 = scalar_lea.vmem %s361_s8, 4096 }
  0x4c   : > { %p1282_p3 = scmp.ne.s32.totalorder %s361_s8, %s1281_s24  ;;  %s1391_s30 = smov [#allocation9]  }
  0x4d   : > { %s1286_s28 = sshll.u32 %s1391_s30, 4  ;;  %s1287_s28 = int_to_ptr.vmem [resolvable:$false] %s1286_s28 }
  0x4e   : > { %p1284_p12 = pnand %p1282_p3, %p1188_p7  ;;  %s1288_s13 = scalar_lea.vmem %s1287_s28, 8192 }
  0x4f   : > { %p1289_p1 = scmp.lt.s32.totalorder %s361_s8, %s1287_s28  ;;  %p1290_p2 = scmp.lt.s32.totalorder %s1288_s13, %s1281_s24 }
  0x50   : > { %p1285_p0 = pneg %p1284_p12 }
  0x51   : > { %p1291_p4 = por %p1290_p2, %p1289_p1 }
  0x53   : > { %p1292_p11 = pnand %p1291_p4, %p1285_p0 }
  0x55   : > { %1295 = shalt.err (!%p1292_p11)
}
  0x56   : > { %1060 = dma.hbm_to_vmem [thread:$0]  (!%p1492_p6), %s359_s15, 4096, %s361_s8, %s347_s2, %s1806_s10, %s1806_s10, %s1805_s11  }
  0x57   : > { %390 = sbr.rel (%p1537_p13) target bundleno = 393 (0x189), region = 48  ;;  %p1808_p7 = scmp.eq.s32.totalorder (!%p1537_p13), %s1511_s16, 0 }
  0x5c   : > { %1347 = dma.done.wait (%p1808_p7), [#allocation4], 256   ;;  %p1809_p10 = pmov %p1808_p7 }
  0x5d   : > { %s396_s24 = sand.u32 1, %s1511_s16   ;;  %s1600_s12 = sand.u32 1, %s1368_s25  }
  0x5e   : > { %1349 = vsyncadd (%p1809_p10), [#allocation4], 4294967040  ;;  %s1021_s14 = sshll.u32 %s1600_s12, 8  ;;  %s397_s18 = scalar_lea.sflag [#allocation7], %s396_s24 }
  0x5f   : > { %s1603_s9 = scalar_lea.vmem [#allocation6], %s1021_s14 }
  0x60   : > { %1351 = dma.done.wait (%p1521_p9), %s397_s18, 8192  }
  0x61   : > { %1353 = vsyncadd (%p1521_p9), %s397_s18, 4294959104  ;;  %s1609_s2 = scalar_lea.vmem [#allocation8], %s1021_s14  ;;  %s415_s23 = scalar_lea.sflag [#allocation10], %s1600_s12 }
  0x62   : > { %s1612_s11 = scalar_lea.vmem [#allocation9], %s1021_s14 }
  0x63   : > { %1355 = dma.done.wait (%p1521_p9), %s415_s23, 4096  }
  0x64   : > { %1357 = vsyncadd (%p1521_p9), %s415_s23, 4294963200  ;;  %v552_v0 = vld [vmem:[%s1609_s2 + $0xf8] sm:$0xff]  ;;  %v551_v2 = vld [vmem:[%s1609_s2 + $0xf0] sm:$0xff]  ;;  %p475_p6 = scmp.lt.s32.totalorder %s1376_s27, 2  ;;  %s1024_s28 = sshll.u32 %s1600_s12, 3 }
  0x65   : > { %v615_v1 = vmul.f32 1.442695, %v552_v0  ;;  %v613_v3 = vmul.f32 1.442695, %v551_v2  ;;  %v550_v4 = vld [vmem:[%s1609_s2 + $0xe8] sm:$0xff]  ;;  %v549_v6 = vld [vmem:[%s1609_s2 + $0xe0] sm:$0xff] }
  0x66   : > { %v611_v5 = vmul.f32 1.442695, %v550_v4  ;;  %v609_v7 = vmul.f32 1.442695, %v549_v6  ;;  %v548_v8 = vld [vmem:[%s1609_s2 + $0xd8] sm:$0xff]  ;;  %v547_v10 = vld [vmem:[%s1609_s2 + $0xd0] sm:$0xff] }
  0x67   : > { %1120 = vpow2.f32 %v615_v1  ;;  %v607_v9 = vmul.f32 1.442695, %v548_v8  ;;  %v605_v11 = vmul.f32 1.442695, %v547_v10  ;;  %v546_v12 = vld [vmem:[%s1609_s2 + $0xc8] sm:$0xff]  ;;  %v545_v14 = vld [vmem:[%s1609_s2 + $0xc0] sm:$0xff] }
  0x68   : > { %1122 = vpow2.f32 %v613_v3  ;;  %v603_v13 = vmul.f32 1.442695, %v546_v12  ;;  %v601_v15 = vmul.f32 1.442695, %v545_v14  ;;  %v544_v16 = vld [vmem:[%s1609_s2 + $0xb8] sm:$0xff]  ;;  %v543_v18 = vld [vmem:[%s1609_s2 + $0xb0] sm:$0xff] }
  0x69   : > { %1124 = vpow2.f32 %v611_v5  ;;  %v599_v17 = vmul.f32 1.442695, %v544_v16  ;;  %v597_v19 = vmul.f32 1.442695, %v543_v18  ;;  %v542_v20 = vld [vmem:[%s1609_s2 + $0xa8] sm:$0xff]  ;;  %v541_v22 = vld [vmem:[%s1609_s2 + $0xa0] sm:$0xff] }
  0x6a   : > { %1126 = vpow2.f32 %v609_v7  ;;  %v595_v21 = vmul.f32 1.442695, %v542_v20  ;;  %v540_v23 = vld [vmem:[%s1609_s2 + $0x98] sm:$0xff]  ;;  %v593_v25 = vmul.f32 1.442695, %v541_v22  ;;  %v647_v26 = vld [vmem:[%s1612_s11 + $0xf0] sm:$0xff] }
  0x6b   : > { %1128 = vpow2.f32 %v607_v9  ;;  %v648_v24 = vld [vmem:[%s1612_s11 + $0xf8] sm:$0xff]  ;;  %v591_v27 = vmul.f32 1.442695, %v540_v23  ;;  %v539_v28 = vld [vmem:[%s1609_s2 + $0x90] sm:$0xff]  ;;  %v646_v31 = vld [vmem:[%s1612_s11 + $0xe8] sm:$0xff]  ;;  %s476_s16 = scalar_select %p475_p6, %s1376_s27, 2 }
  0x6c   : > { %1130 = vpow2.f32 %v605_v11  ;;  %v520_v30 = vld [vmem:[%s1603_s9 + $0xf8] sm:$0xff]  ;;  %v538_v32 = vld [vmem:[%s1609_s2 + $0x88] sm:$0xff]  ;;  %v519_v35 = vld [vmem:[%s1603_s9 + $0xf0] sm:$0xff]  ;;  %v589_v41 = vmul.f32 1.442695, %v539_v28  ;;  %s1026_s13 = sshll.u32 %s1376_s27, 7 }
  0x6d   : > { %1132 = vpow2.f32 %v603_v13  ;;  %v645_v36 = vld [vmem:[%s1612_s11 + $0xe0] sm:$0xff]  ;;  %v518_v39 = vld [vmem:[%s1603_s9 + $0xe8] sm:$0xff]  ;;  %v644_v40 = vld [vmem:[%s1612_s11 + $0xd8] sm:$0xff]  ;;  %v587_v47 = vmul.f32 1.442695, %v538_v32  ;;  %s480_s1 = scalar_lea.vmem %s1776_s5, %s476_s16  ;;  %s483_s20 = scalar_lea.vmem %s1777_s6, %s476_s16 }
  0x6e   : > { %1134 = vpow2.f32 %v601_v15  ;;  %v517_v45 = vld [vmem:[%s1603_s9 + $0xe0] sm:$0xff]  ;;  %v643_v46 = vld [vmem:[%s1612_s11 + $0xd0] sm:$0xff]  ;;  %v516_v52 = vld [vmem:[%s1603_s9 + $0xd8] sm:$0xff]  ;;  %s477_s30 = scalar_lea.vmem %s1775_s4, %s476_s16  ;;  %s467_s24 = scalar_lea.vmem [#allocation11], %s1024_s28 }
  0x6f   : > { %1136 = vpow2.f32 %v599_v17  ;;  %v537_v48 = vld [vmem:[%s1609_s2 + $0x80] sm:$0xff]  ;;  %v642_v53 = vld [vmem:[%s1612_s11 + $0xc8] sm:$0xff]  ;;  %v536_v54 = vld [vmem:[%s1609_s2 + $0x78] sm:$0xff]  ;;  %s823_s14 = sshll.u32 %s467_s24, 4  ;;  %s808_s23 = scalar_lea.sflag [#allocation5], %s1600_s12  ;;  %s824_s14 = int_to_ptr.vmem [resolvable:$true] %s823_s14 }
  0x70   : > { %1138 = vpow2.f32 %v597_v19  ;;  %v585_v61 = vmul.f32 1.442695, %v537_v48  ;;  %v515_v0 = vld [vmem:[%s1603_s9 + $0xd0] sm:$0xff]  ;;  %v641_v2 = vld [vmem:[%s1612_s11 + $0xc0] sm:$0xff]  ;;  %v583_v3 = vmul.f32 1.442695, %v536_v54 }
  0x71   : > { %1140 = vpow2.f32 %v595_v21  ;;  %v535_v4 = vld [vmem:[%s1609_s2 + $0x70] sm:$0xff]  ;;  %v514_v6 = vld [vmem:[%s1603_s9 + $0xc8] sm:$0xff]  ;;  %v640_v7 = vld [vmem:[%s1612_s11 + $0xb8] sm:$0xff]  ;;  %p1810_p13 = scmp.ne.s32.totalorder %s1799_s17, 0  ;;  %s1392_s16 = smov [#allocation11]  }
  0x72   : > { %1142 = vpow2.f32 %v593_v25  ;;  %v534_v8 = vld [vmem:[%s1609_s2 + $0x68] sm:$0xff]  ;;  %v581_v11 = vmul.f32 1.442695, %v535_v4  ;;  %v513_v14 = vld [vmem:[%s1603_s9 + $0xc0] sm:$0xff]  ;;  %v639_v16 = vld [vmem:[%s1612_s11 + $0xb0] sm:$0xff]  ;;  %s1300_s27 = sshll.u32 %s1392_s16, 4  ;;  %s1301_s27 = int_to_ptr.vmem [resolvable:$false] %s1300_s27 }
  0x73   : > { %1144 = vpow2.f32 %v591_v27  ;;  %v579_v17 = vmul.f32 1.442695, %v534_v8  ;;  %v533_v18 = vld [vmem:[%s1609_s2 + $0x60] sm:$0xff]  ;;  %v512_v20 = vld [vmem:[%s1603_s9 + $0xb8] sm:$0xff]  ;;  %v638_v21 = vld [vmem:[%s1612_s11 + $0xa8] sm:$0xff]  ;;  %s1302_s22 = scalar_lea.vmem %s1301_s27, 256  ;;  %p1303_p3 = scmp.lt.s32.totalorder %s824_s14, %s1301_s27 }
  0x74   : > { %v1121_v29 = vpop.eup %1120  ;;  %1146 = vpow2.f32 %v589_v41  ;;  %v532_v22 = vld [vmem:[%s1609_s2 + $0x58] sm:$0xff] }
  0x75   : > { %v1123_v33 = vpop.eup %1122  ;;  %v680_v34 = vmul.f32 %v1121_v29, %v648_v24  ;;  %1148 = vpow2.f32 %v587_v47  ;;  %v511_v24 = vld [vmem:[%s1603_s9 + $0xb0] sm:$0xff]  ;;  %v510_v29 = vld [vmem:[%s1603_s9 + $0xa8] sm:$0xff]  ;;  %v575_v32 = vmul.f32 1.442695, %v532_v22  ;;  %v529_v47 = vld [vmem:[%s1609_s2 + $0x40] sm:$0xff] }
  0x76   : > { %v1125_v37 = vpop.eup %1124  ;;  %v679_v38 = vmul.f32 %v1123_v33, %v647_v26  ;;  %1150 = vpow2.f32 %v585_v61  ;;  %v577_v26 = vmul.f32 1.442695, %v533_v18  ;;  %v531_v33 = vld [vmem:[%s1609_s2 + $0x50] sm:$0xff]  ;;  %v569_v54 = vmul.f32 1.442695, %v529_v47 }
  0x77   : > { %v1127_v42 = vpop.eup %1126  ;;  %v712_v43 = vadd.f32 %v680_v34, %v520_v30  ;;  %v678_v44 = vmul.f32 %v1125_v37, %v646_v31  ;;  %1152 = vpow2.f32 %v583_v3  ;;  %v637_v31 = vld [vmem:[%s1612_s11 + $0xa0] sm:$0xff]  ;;  %v715_v37 = vld [vmem:[#allocation3 + $0x8] sm:$0xff]  ;;  %v527_v61 = vld [vmem:[%s1609_s2 + $0x30] sm:$0xff] }
  0x78   : > { %v1129_v49 = vpop.eup %1128  ;;  %v711_v50 = vadd.f32 %v679_v38, %v519_v35  ;;  %v677_v51 = vmul.f32 %v1127_v42, %v645_v36  ;;  %1154 = vpow2.f32 %v581_v11  ;;  %v636_v35 = vld [vmem:[%s1612_s11 + $0x98] sm:$0xff]  ;;  %v530_v36 = vld [vmem:[%s1609_s2 + $0x48] sm:$0xff]  ;;  %780 = vmatprep.mubr.f32.mxu0 %v715_v37  ;;  %v565_v4 = vmul.f32 1.442695, %v527_v61  ;;  %v525_v11 = vld [vmem:[%s1609_s2 + $0x20] sm:$0xff] }
  0x79   : > { %v1131_v55 = vpop.eup %1130  ;;  %716 = vmatprep.subr.mxu0 %v712_v43  ;;  %v710_v56 = vadd.f32 %v678_v44, %v518_v39  ;;  %v676_v57 = vmul.f32 %v1129_v49, %v644_v40  ;;  %1156 = vpow2.f32 %v579_v17  ;;  %v573_v40 = vmul.f32 1.442695, %v531_v33  ;;  %v509_v43 = vld [vmem:[%s1603_s9 + $0xa0] sm:$0xff]  ;;  %v508_v49 = vld [vmem:[%s1603_s9 + $0x98] sm:$0xff]  ;;  %v627_v37 = vld [vmem:[%s1612_s11 + $0x50] sm:$0xff] }
  0x7a   : > { %v1133_v58 = vpop.eup %1132  ;;  %717 = vmatpush1.xpose.msra.mxu0 %v711_v50  ;;  %v709_v59 = vadd.f32 %v677_v51, %v517_v45  ;;  %v675_v60 = vmul.f32 %v1131_v55, %v643_v46  ;;  %1158 = vpow2.f32 %v577_v26  ;;  %v635_v45 = vld [vmem:[%s1612_s11 + $0x90] sm:$0xff]  ;;  %v571_v46 = vmul.f32 1.442695, %v530_v36  ;;  %v634_v50 = vld [vmem:[%s1612_s11 + $0x88] sm:$0xff]  ;;  %v528_v51 = vld [vmem:[%s1609_s2 + $0x38] sm:$0xff] }
  0x7b   : > { %v1135_v62 = vpop.eup %1134  ;;  %718 = vmatprep.subr.mxu0 %v710_v56  ;;  %v708_v63 = vadd.f32 %v676_v57, %v516_v52  ;;  %v674_v1 = vmul.f32 %v1133_v58, %v642_v53  ;;  %1160 = vpow2.f32 %v575_v32  ;;  %v507_v57 = vld [vmem:[%s1603_s9 + $0x90] sm:$0xff]  ;;  %v561_v18 = vmul.f32 1.442695, %v525_v11 }
  0x7c   : > { %v1137_v5 = vpop.eup %1136  ;;  %v707_v9 = vadd.f32 %v675_v60, %v515_v0  ;;  %v673_v10 = vmul.f32 %v1135_v62, %v641_v2  ;;  %1162 = vpow2.f32 %v573_v40  ;;  %v567_v60 = vmul.f32 1.442695, %v528_v51  ;;  %v632_v0 = vld [vmem:[%s1612_s11 + $0x78] sm:$0xff] }
  0x7d   : > { %v1139_v12 = vpop.eup %1138  ;;  %v706_v13 = vadd.f32 %v674_v1, %v514_v6  ;;  %v672_v15 = vmul.f32 %v1137_v5, %v640_v7  ;;  %1164 = vpow2.f32 %v571_v46  ;;  %v526_v1 = vld [vmem:[%s1609_s2 + $0x28] sm:$0xff]  ;;  %v505_v7 = vld [vmem:[%s1603_s9 + $0x80] sm:$0xff] }
  0x7e   : > { %719 = vmatpush1.xpose.msra.mxu0 %v709_v59  ;;  %v1141_v19 = vpop.eup %1140  ;;  %v705_v23 = vadd.f32 %v673_v10, %v513_v14  ;;  %v671_v25 = vmul.f32 %v1139_v12, %v639_v16  ;;  %v633_v59 = vld [vmem:[%s1612_s11 + $0x80] sm:$0xff]  ;;  %1166 = vpow2.f32 %v569_v54  ;;  %v563_v10 = vmul.f32 1.442695, %v526_v1  ;;  %v630_v14 = vld [vmem:[%s1612_s11 + $0x68] sm:$0xff] }
  0x7f   : > { %720 = vmatprep.subr.mxu0 %v708_v63  ;;  %v1143_v27 = vpop.eup %1142  ;;  %v704_v28 = vadd.f32 %v672_v15, %v512_v20  ;;  %v670_v30 = vmul.f32 %v1141_v19, %v638_v21  ;;  %v506_v63 = vld [vmem:[%s1603_s9 + $0x88] sm:$0xff]  ;;  %1168 = vpow2.f32 %v567_v60  ;;  %v524_v15 = vld [vmem:[%s1609_s2 + $0x18] sm:$0xff]  ;;  %v503_v21 = vld [vmem:[%s1603_s9 + $0x70] sm:$0xff] }
  0x80   : > { %v1145_v34 = vpop.eup %1144  ;;  %v703_v38 = vadd.f32 %v671_v25, %v511_v24  ;;  %v669_v39 = vmul.f32 %v1143_v27, %v637_v31  ;;  %1170 = vpow2.f32 %v565_v4  ;;  %v559_v24 = vmul.f32 1.442695, %v524_v15  ;;  %v523_v25 = vld [vmem:[%s1609_s2 + $0x10] sm:$0xff]  ;;  %v502_v27 = vld [vmem:[%s1603_s9 + $0x68] sm:$0xff] }
  0x81   : > { %v1147_v41 = vpop.eup %1146  ;;  %v702_v42 = vadd.f32 %v670_v30, %v510_v29  ;;  %v668_v44 = vmul.f32 %v1145_v34, %v636_v35  ;;  %1172 = vpow2.f32 %v563_v10  ;;  %v522_v29 = vld [vmem:[%s1609_s2 + $0x8] sm:$0xff]  ;;  %v557_v32 = vmul.f32 1.442695, %v523_v25  ;;  %v501_v35 = vld [vmem:[%s1603_s9 + $0x60] sm:$0xff]  ;;  %v623_v60 = vld [vmem:[%s1612_s11 + $0x30] sm:$0xff] }
  0x82   : > { %721 = vmatpush1.xpose.msra.mxu0 %v707_v9  ;;  %v1149_v48 = vpop.eup %1148  ;;  %v701_v52 = vadd.f32 %v669_v39, %v509_v43  ;;  %v667_v53 = vmul.f32 %v1147_v41, %v635_v45  ;;  %v631_v9 = vld [vmem:[%s1612_s11 + $0x70] sm:$0xff]  ;;  %1174 = vpow2.f32 %v561_v18  ;;  %v521_v39 = vld [vmem:[%s1609_s2] sm:$0xff]  ;;  %v500_v41 = vld [vmem:[%s1603_s9 + $0x58] sm:$0xff]  ;;  %s1730_s2 = scalar_lea.hbm %s1778_s7, %s1026_s13 }
  0x83   : > { %722 = vmatprep.subr.mxu0 %v706_v13  ;;  %v1151_v55 = vpop.eup %1150  ;;  %v700_v56 = vadd.f32 %v668_v44, %v508_v49  ;;  %v666_v58 = vmul.f32 %v1149_v48, %v634_v50  ;;  %v504_v13 = vld [vmem:[%s1603_s9 + $0x78] sm:$0xff]  ;;  %1176 = vpow2.f32 %v559_v24  ;;  %v553_v45 = vmul.f32 1.442695, %v521_v39  ;;  %v499_v48 = vld [vmem:[%s1603_s9 + $0x50] sm:$0xff]  ;;  %v625_v50 = vld [vmem:[%s1612_s11 + $0x40] sm:$0xff] }
  0x84   : > { %v1153_v62 = vpop.eup %1152  ;;  %v699_v2 = vadd.f32 %v667_v53, %v507_v57  ;;  %v665_v3 = vmul.f32 %v1151_v55, %v633_v59  ;;  %1178 = vpow2.f32 %v557_v32  ;;  %v624_v53 = vld [vmem:[%s1612_s11 + $0x38] sm:$0xff]  ;;  %v495_v4 = vld [vmem:[%s1603_s9 + $0x30] sm:$0xff] }
  0x85   : > { %v1155_v5 = vpop.eup %1154  ;;  %v698_v6 = vadd.f32 %v666_v58, %v506_v63  ;;  %v664_v8 = vmul.f32 %v1153_v62, %v632_v0  ;;  %v497_v58 = vld [vmem:[%s1603_s9 + $0x40] sm:$0xff]  ;;  %v496_v62 = vld [vmem:[%s1603_s9 + $0x38] sm:$0xff]  ;;  %v622_v63 = vld [vmem:[%s1612_s11 + $0x28] sm:$0xff] }
  0x86   : > { %723 = vmatpush1.xpose.msra.mxu0 %v705_v23  ;;  %v1157_v12 = vpop.eup %1156  ;;  %v697_v16 = vadd.f32 %v665_v3, %v505_v7  ;;  %v663_v17 = vmul.f32 %v1155_v5, %v631_v9  ;;  %v629_v23 = vld [vmem:[%s1612_s11 + $0x60] sm:$0xff]  ;;  %v620_v9 = vld [vmem:[%s1612_s11 + $0x18] sm:$0xff]  ;;  %v491_v24 = vld [vmem:[%s1603_s9 + $0x10] sm:$0xff] }
  0x87   : > { %724 = vmatprep.subr.mxu0 %v704_v28  ;;  %v1159_v19 = vpop.eup %1158  ;;  %v696_v20 = vadd.f32 %v664_v8, %v504_v13  ;;  %v662_v22 = vmul.f32 %v1157_v12, %v630_v14  ;;  %v628_v28 = vld [vmem:[%s1612_s11 + $0x58] sm:$0xff]  ;;  %v494_v8 = vld [vmem:[%s1603_s9 + $0x28] sm:$0xff]  ;;  %v493_v14 = vld [vmem:[%s1603_s9 + $0x20] sm:$0xff] }
  0x88   : > { %v1161_v26 = vpop.eup %1160  ;;  %v695_v30 = vadd.f32 %v663_v17, %v503_v21  ;;  %v661_v31 = vmul.f32 %v1159_v19, %v629_v23  ;;  %v492_v18 = vld [vmem:[%s1603_s9 + $0x18] sm:$0xff]  ;;  %v618_v19 = vld [vmem:[%s1612_s11 + $0x8] sm:$0xff] }
  0x89   : > { %v1163_v33 = vpop.eup %1162  ;;  %v694_v34 = vadd.f32 %v662_v22, %v502_v27  ;;  %v660_v36 = vmul.f32 %v1161_v26, %v628_v28  ;;  %v617_v26 = vld [vmem:[%s1612_s11] sm:$0xff]  ;;  %v490_v27 = vld [vmem:[%s1603_s9 + $0x8] sm:$0xff] }
  0x8a   : > { %725 = vmatpush1.xpose.msra.mxu0 %v703_v38  ;;  %v555_v38 = vmul.f32 1.442695, %v522_v29  ;;  %v1165_v40 = vpop.eup %1164  ;;  %v693_v43 = vadd.f32 %v661_v31, %v501_v35  ;;  %v659_v44 = vmul.f32 %v1163_v33, %v627_v37  ;;  %v489_v31 = vld [vmem:[%s1603_s9] sm:$0xff]  ;;  %v714_v33 = vld [vmem:[#allocation3] sm:$0xff] }
  0x8b   : > { %726 = vmatprep.subr.mxu0 %v702_v42  ;;  %v626_v42 = vld [vmem:[%s1612_s11 + $0x48] sm:$0xff]  ;;  %v1167_v46 = vpop.eup %1166  ;;  %v692_v47 = vadd.f32 %v660_v36, %v500_v41  ;;  %v800_v36 = vlaneseq  ;;  %v791_v41 = vld [vmem:[%s477_s30] sm:$0x1] }
  0x8c   : > { %v658_v49 = vmul.f32 %v1165_v40, %v626_v42  ;;  %1180 = vpow2.f32 %v555_v38  ;;  %v1169_v51 = vpop.eup %1168  ;;  %v691_v54 = vadd.f32 %v659_v44, %v499_v48  ;;  %v657_v55 = vmul.f32 %v1167_v46, %v625_v50  ;;  %v795_v38 = vld [vmem:[%s483_s20] sm:$0x1] }
  0x8d   : > { %1182 = vpow2.f32 %v553_v45  ;;  %v656_v59 = vmul.f32 %v1169_v51, %v624_v53  ;;  %v801_v40 = vshrl.u32 %v800_v36, 7 }
  0x8e   : > { %727 = vmatpush1.xpose.msra.mxu0 %v701_v52  ;;  %v498_v52 = vld [vmem:[%s1603_s9 + $0x48] sm:$0xff]  ;;  %v689_v0 = vadd.f32 %v657_v55, %v497_v58 }
  0x8f   : > { %728 = vmatprep.subr.mxu0 %v700_v56  ;;  %v1171_v56 = vpop.eup %1170  ;;  %v690_v57 = vadd.f32 %v658_v49, %v498_v52  ;;  %v688_v3 = vadd.f32 %v656_v59, %v496_v62 }
  0x90   : > { %v1173_v61 = vpop.eup %1172  ;;  %v655_v1 = vmul.f32 %v1171_v56, %v623_v60 }
  0x91   : > { %v654_v5 = vmul.f32 %v1173_v61, %v622_v63 }
  0x92   : > { %729 = vmatpush1.xpose.msra.mxu0 %v699_v2  ;;  %v1175_v2 = vpop.eup %1174  ;;  %v687_v10 = vadd.f32 %v655_v1, %v495_v4 }
  0x93   : > { %730 = vmatprep.subr.mxu0 %v698_v6  ;;  %v621_v6 = vld [vmem:[%s1612_s11 + $0x20] sm:$0xff]  ;;  %v1177_v7 = vpop.eup %1176  ;;  %v686_v13 = vadd.f32 %v654_v5, %v494_v8 }
  0x94   : > { %v653_v11 = vmul.f32 %v1175_v2, %v621_v6  ;;  %v1179_v12 = vpop.eup %1178  ;;  %v652_v15 = vmul.f32 %v1177_v7, %v620_v9 }
  0x96   : > { %731 = vmatpush1.xpose.msra.mxu0 %v697_v16  ;;  %v619_v16 = vld [vmem:[%s1612_s11 + $0x10] sm:$0xff]  ;;  %v684_v23 = vadd.f32 %v652_v15, %v492_v18  ;;  %s1296_s11 = scalar_lea.vmem %s824_s14, 128 }
  0x97   : > { %732 = vmatprep.subr.mxu0 %v696_v20  ;;  %v685_v20 = vadd.f32 %v653_v11, %v493_v14  ;;  %v651_v21 = vmul.f32 %v1179_v12, %v619_v16  ;;  %p1297_p9 = scmp.ne.s32.totalorder %s824_s14, %s1296_s11  ;;  %p1304_p12 = scmp.lt.s32.totalorder %s1302_s22, %s1296_s11 }
  0x99   : > { %v1181_v17 = vpop.eup %1180  ;;  %v683_v28 = vadd.f32 %v651_v21, %v491_v24  ;;  %p1298_p5 = pnand %p1297_p9, %p1810_p13  ;;  %p1305_p0 = por %p1304_p12, %p1303_p3 }
  0x9a   : > { %733 = vmatpush1.xpose.msra.mxu0 %v695_v30  ;;  %v1183_v22 = vpop.eup %1182  ;;  %v650_v25 = vmul.f32 %v1181_v17, %v618_v19 }
  0x9b   : > { %734 = vmatprep.subr.mxu0 %v694_v34  ;;  %v649_v29 = vmul.f32 %v1183_v22, %v617_v26  ;;  %v792_v34 = vld [vmem:[%s480_s1] sm:$0x1]  ;;  %p1299_p8 = pneg %p1298_p5 }
  0x9c   : > { %v682_v30 = vadd.f32 %v650_v25, %v490_v27  ;;  %v793_v35 = vmul.f32 1.442695, %v792_v34 }
  0x9d   : > { %v681_v32 = vadd.f32 %v649_v29, %v489_v31  ;;  %p1306_p1 = pnand %p1305_p0, %p1299_p8 }
  0x9e   : > { %735 = vmatpush1.xpose.msra.mxu0 %v693_v43  ;;  %1184 = vpow2.f32 %v793_v35  ;;  %v802_v43 = vsub.s32 0, %v801_v40 }
  0x9f   : > { %736 = vmatprep.subr.mxu0 %v692_v47 }
  0xa2   : > { %737 = vmatpush1.xpose.msra.mxu0 %v691_v54 }
  0xa3   : > { %738 = vmatprep.subr.mxu0 %v690_v57 }
  0xa6   : > { %739 = vmatpush1.xpose.msra.mxu0 %v689_v0 }
  0xa7   : > { %740 = vmatprep.subr.mxu0 %v688_v3 }
  0xaa   : > { %741 = vmatpush1.xpose.msra.mxu0 %v687_v10 }
  0xab   : > { %742 = vmatprep.subr.mxu0 %v686_v13  ;;  %v1185_v37 = vpop.eup %1184 }
  0xac   : > { %v796_v39 = vmul.f32 %v1185_v37, %v795_v38 }
  0xae   : > { %743 = vmatpush1.xpose.msra.mxu0 %v685_v20  ;;  %v797_v42 = vadd.f32 %v796_v39, %v791_v41 }
  0xaf   : > { %744 = vmatprep.subr.mxu0 %v684_v23 }
  0xb0   : > { %v803_v44 = vrot.slane %v797_v42, %v802_v43 }
  0xb2   : > { %745 = vmatpush1.xpose.msra.mxu0 %v683_v28 }
  0xb3   : > { %746 = vmatprep.subr.mxu0 %v682_v30 }
  0xb6   : > { %747 = vmatpush1.xpose.msra.mxu0 %v681_v32 }
  0xb9   : > { %781 = vmatmul.mubr.f32.vlgmr.msra.gmra.mxu0 %v714_v33 }
 0x179   : > { %v782_v45 = vpop.f32.mrf.mxu0 }
 0x17a   : > { %v805_v46 = vadd.f32 %v803_v44, %v782_v45 }
 0x17b   : > { %v784_v47 = vpop.f32.mrf.mxu0 }
 0x17c   : > { %806 = vst [vmem:[%s467_s24] sm:$0xff] %v805_v46 }
 0x17d   : > { %1309 = shalt.err (!%p1306_p1)
}
 0x17e   : > { %s1310_s10 = scalar_lea.hbm %s1730_s2, 128  ;;  %s1314_s21 = scalar_lea.hbm %s1778_s7, 384 }
 0x17f   : > { %p1311_p2 = scmp.ne.s32.totalorder %s1730_s2, %s1310_s10  ;;  %p1315_p7 = scmp.lt.s32.totalorder %s1730_s2, %s1778_s7 }
 0x180   : > { %p1316_p10 = scmp.lt.s32.totalorder %s1314_s21, %s1310_s10 }
 0x181   : > { %p1312_p4 = pnand %p1311_p2, %p1810_p13 }
 0x182   : > { %p1317_p6 = por %p1316_p10, %p1315_p7 }
 0x183   : > { %p1313_p11 = pneg %p1312_p4 }
 0x185   : > { %p1318_p9 = pnand %p1317_p6, %p1313_p11 }
 0x187   : > { %1321 = shalt.err (!%p1318_p9)
}
 0x188   : > { %1045 = dma.vmem_to_hbm [thread:$0]  (%p1810_p13), %s824_s14, 128, %s1730_s2, %s808_s23  }
 0x189 PF: > { %s1811_s8 = sld [smem:[#allocation16_spill]]  ;;  %p1068_p5 = scmp.ge.s32.totalorder %s1384_s29, 2 }
 0x18a   : > { %s1812_s19 = sld [smem:[#allocation20_spill]] }
 0x18f   : > { %s835_s30 = sand.u32 1, %s1811_s8  }
 0x190   : > { %p1813_p8 = scmp.ne.s32.totalorder %s1812_s19, 0  ;;  %s836_s28 = scalar_lea.sflag [#allocation5], %s835_s30 }
 0x192   : > { %p1062_p3 = pnand %p1068_p5, %p1813_p8 }
 0x194   : > { %p1063_p12 = pneg %p1062_p3 }
 0x196   : > { %1359 = dma.done.wait (%p1063_p12), %s836_s28, 128  }
 0x197   : > { %1361 = vsyncadd (%p1063_p12), %s836_s28, 4294967168  ;;  %s27_s29 = sadd.s32 1, %s1384_s29   ;;  %s1814_s17 = sld [smem:[#allocation19_spill]] }
 0x198   : > { %p24_p0 = scmp.ge.s32.totalorder %s27_s29, 5   ;;  %s1815_s27 = sld [smem:[#allocation17_spill]] }
 0x199   : > { %s1816_s28 = sld [smem:[#allocation18_spill]]  ;;  %s1817_s24 = smov %s1368_s25 }
 0x19a   : > { %s1818_s25 = smov %s1372_s26  ;;  %26 = sbr.rel (!%p24_p0) target bundleno = 12 (0xc), region = 140 }
 0x19d   : > { %s1819_s26 = smov %s1814_s17 }
 0x19f   :  { %841 = vsyncpa [#allocation4], 1 }
 0x1a0   :  { %843 = vsyncpa [#allocation4 + $0x1], 1 }
 0x1a1   :  { %844 = vsyncpa [#allocation7], 1 }
 0x1a2   :  { %846 = vsyncpa [#allocation7 + $0x1], 1 }
 0x1a3   :  { %847 = vsyncpa [#allocation10], 1 }
 0x1a4   :  { %849 = vsyncpa [#allocation10 + $0x1], 1 }
 0x1a5   :  { %850 = vsyncpa [#allocation5], 1 }
 0x1a6   :  { %852 = vsyncpa [#allocation5 + $0x1], 1 }

</bundles_post_ra>
